<compile_context>
chip_gen: v7x
topology: tpu7x:2x2x1
jax: 0.10.0
libtpu: 0.0.40
codegen_flags: <defaults>
</compile_context>

<pallas_src>
import functools

import jax
import jax.numpy as jnp
from jax.experimental import pallas as pl
from jax.experimental.pallas import tpu as pltpu

DEFAULT_POLYDEGREE = 3
POLY_OUTPUT_SIZE = (DEFAULT_POLYDEGREE + 1) * (DEFAULT_POLYDEGREE + 2) // 2  # = 10

_LANES = 128
_MIN_SUBLANES = 8
_DEFAULT_BLOCK_ROWS = 512          # (512, 128) f32 tile = 256 KiB
_SMALL_N_THRESHOLD = 8192          # below this, plain XLA is as fast or faster


def _round_up(x, m):
    return ((x + m - 1) // m) * m


def _approp_kernel(w_ref, b_ref, yt_ref, rt_ref, out_ref, *, max_approp):
    # w_ref: SMEM f32[10], b_ref: SMEM f32[1]
    # yt_ref/rt_ref/out_ref: VMEM f32[block_rows, 128]
    x1 = yt_ref[...]                 # yt
    x2 = x1 * rt_ref[...]            # yt * rt

    x1sq = x1 * x1
    x2sq = x2 * x2
    x1x2 = x1 * x2

    w = [w_ref[k] for k in range(POLY_OUTPUT_SIZE)]
    c0 = b_ref[0] + w[0]             # bias + constant-1 column weight (scalar add)

    # Horner-style grouping of the degree-3 bivariate polynomial
    # (same coefficients / column order as sklearn-style PolyFeatures):
    #   z = c0 + x1*(w1 + w3*x1 + w6*x1^2)
    #          + x2*(w2 + w5*x2 + w9*x2^2)
    #          + x1*x2*(w4 + w7*x1 + w8*x2)
    z = (c0
         + x1 * (w[1] + w[3] * x1 + w[6] * x1sq)
         + x2 * (w[2] + w[5] * x2 + w[9] * x2sq)
         + x1x2 * (w[4] + w[7] * x1 + w[8] * x2))

    # sigmoid via EUP tanh (exact identity), avoids a VALU divide.
    out_ref[...] = max_approp * (0.5 * jnp.tanh(0.5 * z) + 0.5)


def _reference_forward(yt, rt, weight, bias, max_approp):
    """Pure-JAX replica of the PyTorch forward (verification / small-N path)."""
    x1 = yt.astype(jnp.float32)
    x2 = x1 * rt.astype(jnp.float32)
    cols = [jnp.ones_like(x1), x1, x2,
            x1 * x1, x1 * x2, x2 * x2,
            x1 ** 3, x1 * x1 * x2, x1 * x2 * x2, x2 ** 3]
    XP = jnp.stack(cols, axis=1)                       # (N, 10)
    z = XP @ weight.reshape(-1, 1) + bias              # (N, 1)
    return max_approp * jax.nn.sigmoid(z)


def approp_rule_forward(yt, rt, weight, bias, max_approp, *,
                        block_rows=None, use_pallas=None):
    """yt, rt: (N,) f32.  weight: (10,) f32, bias: (1,) f32.  Returns (N, 1) f32.

    max_approp must be a static Python/NumPy scalar (it is a module constant
    in the PyTorch spec); it is baked into the kernel at trace time.
    """
    N = yt.shape[0]

    if use_pallas is None:
        use_pallas = N >= _SMALL_N_THRESHOLD
    if not use_pallas:
        return _reference_forward(yt, rt, weight.astype(jnp.float32),
                                  bias.astype(jnp.float32), float(max_approp))

    # --- layout: pad N up to rows_total * 128 and view as (rows_total, 128) ---
    rows_needed = max(1, (N + _LANES - 1) // _LANES)
    if block_rows is None:
        block_rows = min(_DEFAULT_BLOCK_ROWS, _round_up(rows_needed, _MIN_SUBLANES))
    block_rows = _round_up(int(block_rows), _MIN_SUBLANES)
    rows_total = _round_up(rows_needed, block_rows)
    n_pad = rows_total * _LANES
    num_blocks = rows_total // block_rows

    pad = n_pad - N
    ytp = jnp.pad(yt.astype(jnp.float32), (0, pad)).reshape(rows_total, _LANES)
    rtp = jnp.pad(rt.astype(jnp.float32), (0, pad)).reshape(rows_total, _LANES)

    vec_spec = pl.BlockSpec((block_rows, _LANES), lambda i: (i, 0))

    out = pl.pallas_call(
        functools.partial(_approp_kernel, max_approp=float(max_approp)),
        out_shape=jax.ShapeDtypeStruct((rows_total, _LANES), jnp.float32),
        grid=(num_blocks,),
        in_specs=[
            pl.BlockSpec(memory_space=pltpu.MemorySpace.SMEM),   # weight (10,)
            pl.BlockSpec(memory_space=pltpu.MemorySpace.SMEM),   # bias (1,)
            vec_spec,                                            # yt tiles
            vec_spec,                                            # rt tiles
        ],
        out_specs=vec_spec,
        compiler_params=pltpu.CompilerParams(
            dimension_semantics=("parallel",)),                  # megacore split on v7x
    )(weight.astype(jnp.float32), bias.astype(jnp.float32), ytp, rtp)

    return out.reshape(-1)[:N].reshape(N, 1)


if __name__ == "__main__":
    key = jax.random.PRNGKey(0)
    k_yt, k_rt, k_w, k_b = jax.random.split(key, 4)

    max_approp = 5.0

    # Deterministic nn.Linear(10, 1)-style init: U(-1/sqrt(10), 1/sqrt(10)).
    bound = 1.0 / jnp.sqrt(float(POLY_OUTPUT_SIZE))
    weight = jax.random.uniform(k_w, (POLY_OUTPUT_SIZE,), jnp.float32,
                                minval=-bound, maxval=bound)
    bias = jax.random.uniform(k_b, (1,), jnp.float32, minval=-bound, maxval=bound)

    # Case 1: tiny N, forced through the Pallas path (single (8,128) tile).
    # Case 2: N=2000 with block_rows=8 -> 2-step grid, exercises pipelining and
    #         the ragged/padded tail.
    for N, blk in ((8, None), (2000, 8)):
        yt = jax.random.uniform(k_yt, (N,), jnp.float32, minval=0.0, maxval=2.0)
        rt = jax.random.uniform(k_rt, (N,), jnp.float32, minval=-1.0, maxval=1.0)

        pred = approp_rule_forward(yt, rt, weight, bias, max_approp,
                                   block_rows=blk, use_pallas=True)
        pred = jax.block_until_ready(pred)

        ref = _reference_forward(yt, rt, weight, bias, max_approp)
        assert pred.shape == (N, 1)
        assert jnp.allclose(pred, ref, atol=1e-4, rtol=1e-4), (
            f"mismatch at N={N}: max abs err "
            f"{float(jnp.max(jnp.abs(pred - ref)))}")

    print("KERNEL_OK")
</pallas_src>

<mosaic_0001>
module attributes {stable_mosaic.version = 11 : i64} {
  func.func @_approp_kernel(%arg0: i32, %arg1: memref<10xf32, #tpu.memory_space<smem>>, %arg2: memref<1xf32, #tpu.memory_space<smem>>, %arg3: memref<8x128xf32, #tpu.memory_space<vmem>>, %arg4: memref<8x128xf32, #tpu.memory_space<vmem>>, %arg5: memref<8x128xf32, #tpu.memory_space<vmem>>) attributes {dimension_semantics = [#tpu.dimension_semantics<parallel>], iteration_bounds = array<i64: 1>, scalar_prefetch = 0 : i64, scratch_operands = 0 : i64, tpu.core_type = #tpu.core_type<tc>, window_params = [{transform_indices = @transform_0, window_bounds = array<i64: 10>}, {transform_indices = @transform_1, window_bounds = array<i64: 1>}, {transform_indices = @transform_2, window_bounds = array<i64: 8, 128>}, {transform_indices = @transform_3, window_bounds = array<i64: 8, 128>}, {transform_indices = @transform_4, window_bounds = array<i64: 8, 128>}]} {
    %c0 = arith.constant 0 : index
    %c0_0 = arith.constant 0 : index
    %0 = vector.load %arg3[%c0, %c0_0] : memref<8x128xf32, #tpu.memory_space<vmem>>, vector<8x128xf32>
    %c0_1 = arith.constant 0 : index
    %c0_2 = arith.constant 0 : index
    %1 = vector.load %arg4[%c0_1, %c0_2] : memref<8x128xf32, #tpu.memory_space<vmem>>, vector<8x128xf32>
    %2 = arith.mulf %0, %1 : vector<8x128xf32>
    %3 = arith.mulf %0, %0 : vector<8x128xf32>
    %4 = arith.mulf %2, %2 : vector<8x128xf32>
    %5 = arith.mulf %0, %2 : vector<8x128xf32>
    %c0_3 = arith.constant 0 : index
    %6 = memref.load %arg1[%c0_3] : memref<10xf32, #tpu.memory_space<smem>>
    %c1 = arith.constant 1 : index
    %7 = memref.load %arg1[%c1] : memref<10xf32, #tpu.memory_space<smem>>
    %c2 = arith.constant 2 : index
    %8 = memref.load %arg1[%c2] : memref<10xf32, #tpu.memory_space<smem>>
    %c3 = arith.constant 3 : index
    %9 = memref.load %arg1[%c3] : memref<10xf32, #tpu.memory_space<smem>>
    %c4 = arith.constant 4 : index
    %10 = memref.load %arg1[%c4] : memref<10xf32, #tpu.memory_space<smem>>
    %c5 = arith.constant 5 : index
    %11 = memref.load %arg1[%c5] : memref<10xf32, #tpu.memory_space<smem>>
    %c6 = arith.constant 6 : index
    %12 = memref.load %arg1[%c6] : memref<10xf32, #tpu.memory_space<smem>>
    %c7 = arith.constant 7 : index
    %13 = memref.load %arg1[%c7] : memref<10xf32, #tpu.memory_space<smem>>
    %c8 = arith.constant 8 : index
    %14 = memref.load %arg1[%c8] : memref<10xf32, #tpu.memory_space<smem>>
    %c9 = arith.constant 9 : index
    %15 = memref.load %arg1[%c9] : memref<10xf32, #tpu.memory_space<smem>>
    %c0_4 = arith.constant 0 : index
    %16 = memref.load %arg2[%c0_4] : memref<1xf32, #tpu.memory_space<smem>>
    %17 = arith.addf %16, %6 : f32
    %18 = vector.broadcast %9 : f32 to vector<8x128xf32>
    %19 = arith.mulf %18, %0 : vector<8x128xf32>
    %20 = vector.broadcast %7 : f32 to vector<8x128xf32>
    %21 = arith.addf %20, %19 : vector<8x128xf32>
    %22 = vector.broadcast %12 : f32 to vector<8x128xf32>
    %23 = arith.mulf %22, %3 : vector<8x128xf32>
    %24 = arith.addf %21, %23 : vector<8x128xf32>
    %25 = arith.mulf %0, %24 : vector<8x128xf32>
    %26 = vector.broadcast %17 : f32 to vector<8x128xf32>
    %27 = arith.addf %26, %25 : vector<8x128xf32>
    %28 = vector.broadcast %11 : f32 to vector<8x128xf32>
    %29 = arith.mulf %28, %2 : vector<8x128xf32>
    %30 = vector.broadcast %8 : f32 to vector<8x128xf32>
    %31 = arith.addf %30, %29 : vector<8x128xf32>
    %32 = vector.broadcast %15 : f32 to vector<8x128xf32>
    %33 = arith.mulf %32, %4 : vector<8x128xf32>
    %34 = arith.addf %31, %33 : vector<8x128xf32>
    %35 = arith.mulf %2, %34 : vector<8x128xf32>
    %36 = arith.addf %27, %35 : vector<8x128xf32>
    %37 = vector.broadcast %13 : f32 to vector<8x128xf32>
    %38 = arith.mulf %37, %0 : vector<8x128xf32>
    %39 = vector.broadcast %10 : f32 to vector<8x128xf32>
    %40 = arith.addf %39, %38 : vector<8x128xf32>
    %41 = vector.broadcast %14 : f32 to vector<8x128xf32>
    %42 = arith.mulf %41, %2 : vector<8x128xf32>
    %43 = arith.addf %40, %42 : vector<8x128xf32>
    %44 = arith.mulf %5, %43 : vector<8x128xf32>
    %45 = arith.addf %36, %44 : vector<8x128xf32>
    %cst = arith.constant 5.000000e-01 : f32
    %46 = vector.broadcast %cst : f32 to vector<8x128xf32>
    %47 = arith.mulf %46, %45 : vector<8x128xf32>
    %48 = math.tanh %47 : vector<8x128xf32>
    %cst_5 = arith.constant 5.000000e-01 : f32
    %49 = vector.broadcast %cst_5 : f32 to vector<8x128xf32>
    %50 = arith.mulf %49, %48 : vector<8x128xf32>
    %cst_6 = arith.constant 5.000000e-01 : f32
    %51 = vector.broadcast %cst_6 : f32 to vector<8x128xf32>
    %52 = arith.addf %50, %51 : vector<8x128xf32>
    %cst_7 = arith.constant 5.000000e+00 : f32
    %53 = vector.broadcast %cst_7 : f32 to vector<8x128xf32>
    %54 = arith.mulf %53, %52 : vector<8x128xf32>
    %c0_8 = arith.constant 0 : index
    %c0_9 = arith.constant 0 : index
    %55 = vector.load %arg5[%c0_8, %c0_9] : memref<8x128xf32, #tpu.memory_space<vmem>>, vector<8x128xf32>
    tpu.vector_store %arg5[%c0_8, %c0_9], %54 {strides = array<i32>} : memref<8x128xf32, #tpu.memory_space<vmem>>, vector<8x128xf32>,
    return
  }
  func.func @transform_0(%arg0: i32) -> i32 {
    %c0_i32 = arith.constant 0 : i32
    %c0_i32_0 = arith.constant 0 : i32
    return %c0_i32 : i32
  }
  func.func @transform_1(%arg0: i32) -> i32 {
    %c0_i32 = arith.constant 0 : i32
    %c0_i32_0 = arith.constant 0 : i32
    return %c0_i32 : i32
  }
  func.func @transform_2(%arg0: i32) -> (i32, i32) {
    %c0_i32 = arith.constant 0 : i32
    %c0_i32_0 = arith.constant 0 : i32
    return %arg0, %c0_i32 : i32, i32
  }
  func.func @transform_3(%arg0: i32) -> (i32, i32) {
    %c0_i32 = arith.constant 0 : i32
    %c0_i32_0 = arith.constant 0 : i32
    return %arg0, %c0_i32 : i32, i32
  }
  func.func @transform_4(%arg0: i32) -> (i32, i32) {
    %c0_i32 = arith.constant 0 : i32
    %c0_i32_0 = arith.constant 0 : i32
    return %arg0, %c0_i32 : i32, i32
  }
}

</mosaic_0001>

<bundles_post_ra>
// kernel: tpu_custom_call.1
= control target key start
LH: loop header
LB: loop body
LE: loop exit
PB: predicated region body
PF: predicated region fallthrough
CT: control target
= control target key end

     0   :  { %10 = vsyncpa [#allocation6], 0  ;;  %s252_s0 = inlined_call_operand.vmem [shape: f32[10], index: 0, kind: input, shape index: {}]   ;;  %s253_s1 = inlined_call_operand.<no memory space> [shape: f32[1], index: 1, kind: input, shape index: {}]   ;;  %s254_s2 = inlined_call_operand.hbm [shape: f32[8,128], index: 2, kind: input, shape index: {}]   ;;  %s255_s3 = inlined_call_operand.vmem [shape: f32[8,128], index: 3, kind: input, shape index: {}]   ;;  %s256_s4 = inlined_call_operand.hbm [shape: f32[8,128], index: 4, kind: output, shape index: {}]  }
   0x1   :  { %11 = vsyncpa [#allocation4], 0 }
   0x2   :  { %12 = vsyncpa [#allocation5], 0  ;;  %s19_s17 = sshll.u32 %s252_s0, 4  ;;  %s20_s17 = int_to_ptr.vmem [resolvable:$true] %s19_s17 }
   0x3   :  { %s126_s18 = scalar_lea.vmem %s20_s17, 16  ;;  %p131_p1 = scmp.lt.s32.totalorder %s20_s17, %s20_s17 }
   0x4   :  { %p127_p0 = scmp.ne.s32.totalorder %s20_s17, %s126_s18  ;;  %p132_p2 = scmp.lt.s32.totalorder %s126_s18, %s126_s18 }
   0x6   :  { %p133_p3 = por %p132_p2, %p131_p1 }
   0x8   :  { %p134_p4 = pnand %p133_p3, %p127_p0 }
   0xa   :  { %137 = shalt.err (!%p134_p4)
}
   0xb   :  { %s188_s19 = smov [#allocation3]   ;;  %s189_s20 = smov [#allocation7]  }
   0xc   :  { %22 = dma.vmem_to_smem %s20_s17, 16, %s188_s19, [#allocation6]  }
   0xd   :  { %s31_s21 = sshll.u32 %s189_s20, 4  ;;  %s138_s24 = scalar_lea.hbm %s254_s2, 128  ;;  %s32_s21 = int_to_ptr.vmem [resolvable:$true] %s31_s21 }
   0xe   :  { %p139_p5 = scmp.ne.s32.totalorder %s254_s2, %s138_s24  ;;  %p142_p6 = scmp.lt.u32.totalorder %s138_s24, %s254_s2 }
  0x10   :  { %p144_p7 = pnand %p142_p6, %p139_p5 }
  0x12   :  { %147 = shalt.err (!%p144_p7)
}
  0x13   :  { %s148_s28 = scalar_lea.vmem %s32_s21, 128  ;;  %p153_p9 = scmp.lt.s32.totalorder %s32_s21, %s32_s21 }
  0x14   :  { %p149_p8 = scmp.ne.s32.totalorder %s32_s21, %s148_s28  ;;  %p154_p10 = scmp.lt.s32.totalorder %s148_s28, %s148_s28 }
  0x16   :  { %p155_p11 = por %p154_p10, %p153_p9 }
  0x18   :  { %p156_p12 = pnand %p155_p11, %p149_p8 }
  0x1a   :  { %159 = shalt.err (!%p156_p12)
}
  0x1b   :  { %34 = dma.hbm_to_vmem [thread:$0]  %s254_s2, 128, %s32_s21, [#allocation4]  }
  0x1c   :  { %182 = dma.done.wait [#allocation6], 16  }
  0x1d   :  { %183 = vsyncadd [#allocation6], 4294967280 }
  0x1e   :  { %184 = dma.done.wait [#allocation4], 128  }
  0x1f   :  { %185 = vsyncadd [#allocation4], 4294967168 }
  0x20   :  { %43 = sfence }
  0x21   :  { %v44_v0 = vld [vmem:[#allocation7] sm:$0xff]  ;;  %s234_s7 = sld [smem:[#allocation3]]  ;;  %s112_s8 = sld [smem:[#allocation3 + $0x1]] }
  0x22   :  { %v45_v1 = vld [vmem:[%s255_s3] sm:$0xff]  ;;  %s113_s9 = sld [smem:[#allocation3 + $0x2]]  ;;  %s114_s10 = sld [smem:[#allocation3 + $0x3]]  ;;  %v47_v3 = vmul.f32 %v44_v0, %v44_v0 }
  0x23   :  { %s115_s11 = sld [smem:[#allocation3 + $0x4]]  ;;  %s116_s12 = sld [smem:[#allocation3 + $0x5]]  ;;  %v46_v2 = vmul.f32 %v45_v1, %v44_v0 }
  0x24   :  { %s117_s2 = sld [smem:[#allocation3 + $0x6]]  ;;  %s118_s13 = sld [smem:[#allocation3 + $0x7]] }
  0x25   :  { %s119_s14 = sld [smem:[#allocation3 + $0x8]]  ;;  %s120_s15 = sld [smem:[#allocation3 + $0x9]]  ;;  %v48_v4 = vmul.f32 %v46_v2, %v46_v2  ;;  %v49_v21 = vmul.f32 %v46_v2, %v44_v0 }
  0x27   :  { %v64_v6 = vstv %s112_s8  ;;  %s61_s17 = sadd.f32 %s234_s7, %s253_s1  ;;  %s190_s1 = smov [#allocation8]  }
  0x28   :  { %v62_v5 = vstv %s114_s10  ;;  %v74_v9 = vstv %s113_s9  ;;  %s102_s18 = sshll.u32 %s190_s1, 4  ;;  %s103_s18 = int_to_ptr.vmem [resolvable:$true] %s102_s18 }
  0x29   :  { %v63_v7 = vmul.f32 %v62_v5, %v44_v0  ;;  %v72_v8 = vstv %s116_s12  ;;  %v83_v13 = vstv %s115_s11  ;;  %v70_v25 = vstv %s61_s17  ;;  %s160_s19 = scalar_lea.vmem %s103_s18, 128  ;;  %p165_p0 = scmp.lt.s32.totalorder %s103_s18, %s103_s18 }
  0x2a   :  { %v66_v10 = vstv %s117_s2  ;;  %v73_v11 = vmul.f32 %v72_v8, %v46_v2  ;;  %v81_v12 = vstv %s118_s13  ;;  %p161_p13 = scmp.ne.s32.totalorder %s103_s18, %s160_s19  ;;  %p166_p1 = scmp.lt.s32.totalorder %s160_s19, %s160_s19 }
  0x2b   :  { %v65_v14 = vadd.f32 %v64_v6, %v63_v7  ;;  %v67_v15 = vmul.f32 %v66_v10, %v47_v3  ;;  %v76_v16 = vstv %s120_s15  ;;  %v82_v17 = vmul.f32 %v81_v12, %v44_v0 }
  0x2c   :  { %v75_v18 = vadd.f32 %v74_v9, %v73_v11  ;;  %v77_v19 = vmul.f32 %v76_v16, %v48_v4  ;;  %v85_v20 = vstv %s119_s14  ;;  %p167_p2 = por %p166_p1, %p165_p0 }
  0x2d   :  { %v68_v22 = vadd.f32 %v67_v15, %v65_v14  ;;  %v84_v23 = vadd.f32 %v83_v13, %v82_v17  ;;  %v86_v24 = vmul.f32 %v85_v20, %v46_v2 }
  0x2e   :  { %v78_v26 = vadd.f32 %v77_v19, %v75_v18  ;;  %p168_p3 = pnand %p167_p2, %p161_p13 }
  0x2f   :  { %v69_v27 = vmul.f32 %v68_v22, %v44_v0  ;;  %v87_v28 = vadd.f32 %v86_v24, %v84_v23 }
  0x30   :  { %v79_v29 = vmul.f32 %v78_v26, %v46_v2 }
  0x31   :  { %v71_v30 = vadd.f32 %v70_v25, %v69_v27  ;;  %v88_v31 = vmul.f32 %v87_v28, %v49_v21 }
  0x33   :  { %v80_v32 = vadd.f32 %v79_v29, %v71_v30 }
  0x35   :  { %v89_v33 = vadd.f32 %v88_v31, %v80_v32 }
  0x37   :  { %v90_v34 = vmul.f32 0.5, %v89_v33 }
  0x39   :  { %124 = vtanh.f32 %v90_v34 }
  0x43   :  { %v125_v35 = vpop.eup %124 }
  0x44   :  { %v92_v36 = vmul.f32 0.5, %v125_v35 }
  0x46   :  { %v93_v37 = vadd.f32 0.5, %v92_v36 }
  0x48   :  { %v94_v38 = vmul.f32 5.0, %v93_v37 }
  0x4a   :  { %95 = vst [vmem:[#allocation8] sm:$0xff] %v94_v38 }
  0x4b   :  { %171 = shalt.err (!%p168_p3)
}
  0x4c   :  { %s172_s22 = scalar_lea.hbm %s256_s4, 128 }
  0x4d   :  { %p173_p4 = scmp.ne.s32.totalorder %s256_s4, %s172_s22  ;;  %p176_p5 = scmp.lt.u32.totalorder %s172_s22, %s256_s4 }
  0x4f   :  { %p178_p6 = pnand %p176_p5, %p173_p4 }
  0x51   :  { %181 = shalt.err (!%p178_p6)
}
  0x52   :  { %105 = dma.vmem_to_hbm [thread:$0]  %s103_s18, 128, %s256_s4, [#allocation5]  }
  0x53   :  { %186 = dma.done.wait [#allocation5], 128  }
  0x54   :  { %187 = vsyncadd [#allocation5], 4294967168 }
  0x55   :  { %109 = vsyncpa [#allocation4], 1 }
  0x56   :  { %110 = vsyncpa [#allocation5], 1 }
  0x57   :  { %111 = vsyncpa [#allocation6], 1 }

</bundles_post_ra>
